<compile_context>
chip_gen: v7x
topology: tpu7x:2x2x1
jax: 0.10.0
libtpu: 0.0.40
codegen_flags: <defaults>
</compile_context>

<pallas_src>
import math
import functools

import jax
import jax.numpy as jnp
from jax.experimental import pallas as pl
from jax.experimental.pallas import tpu as pltpu

EPS = 1e-5


# ---------------------------------------------------------------------------
# Fused kernel: BN normalize (precomputed stats) + QKV projection + MHSA.
# One grid step processes a (Bt, F, E) batch tile; BN stats, W and bias stay
# resident.  Heads are unrolled at trace time; each head's dots are batched
# over Bt.
# ---------------------------------------------------------------------------
def _fused_mhsa_kernel(x_ref, mean_ref, inv_std_ref, w_ref, bias_ref, o_ref,
                       *, num_heads, head_dim):
    Bt, F, E = x_ref.shape
    H, Dh = num_heads, head_dim

    # ---- BatchNorm1d normalize with precomputed per-feature stats.
    x = x_ref[...].astype(jnp.float32)                     # (Bt, F, E)
    mean = mean_ref[...].astype(jnp.float32)               # (1, F, 1)
    inv_std = inv_std_ref[...].astype(jnp.float32)         # (1, F, 1)
    xn = (x - mean) * inv_std                               # (Bt, F, E)

    # ---- Single lane-dense QKV projection, M = Bt*F rows.
    xn2 = xn.reshape(Bt * F, E)                              # merge leading dims only
    w = w_ref[...].astype(jnp.float32)                       # (E, 3E)  cols = [Q|K|V], head-grouped
    bias = bias_ref[...].astype(jnp.float32)                 # (1, 3E)
    qkv = jnp.dot(xn2, w, preferred_element_type=jnp.float32) + bias   # (Bt*F, 3E)
    qkv = qkv.reshape(Bt, F, 3 * E)                          # split leading dim only

    # ---- Per-head scaled dot-product attention (scale already folded into Q).
    head_outs = []
    for h in range(H):                                       # trace-time unrolled, batched over Bt
        q = qkv[:, :, h * Dh:(h + 1) * Dh]                   # (Bt, F, Dh)
        k = qkv[:, :, E + h * Dh:E + (h + 1) * Dh]           # (Bt, F, Dh)
        v = qkv[:, :, 2 * E + h * Dh:2 * E + (h + 1) * Dh]   # (Bt, F, Dh)

        logits = jnp.einsum('bqd,bkd->bqk', q, k,
                            preferred_element_type=jnp.float32)       # (Bt, F, F)
        m = jnp.max(logits, axis=-1, keepdims=True)
        p = jnp.exp(logits - m)
        denom = jnp.sum(p, axis=-1, keepdims=True)
        attn = p * pl.reciprocal(denom, approx=True)
        head_outs.append(jnp.einsum('bqk,bkd->bqd', attn, v,
                                    preferred_element_type=jnp.float32))  # (Bt, F, Dh)

    # Heads concatenated along E -> one lane-dense (Bt, F, E) store.
    o_ref[...] = jnp.concatenate(head_outs, axis=-1).astype(o_ref.dtype)


def multihead_self_attention(x, w_qkv, b_qkv, num_heads, *, batch_tile=None):
    """
    x:      (B, F, E)  float32
    w_qkv:  (3E, E)    PyTorch Linear layout (out_features, in_features)
    b_qkv:  (3E,)
    returns (B, F, E)  -- same as the PyTorch module's default forward.
    """
    B, F, E = x.shape
    H = num_heads
    assert E % H == 0
    Dh = E // H

    # One step for small problems (reads x once, no per-step overhead).  For
    # large B pick Bt so Bt*F >= 256 and the (Bt,F,E) blocks fit VMEM.
    bt = B if batch_tile is None else batch_tile
    assert B % bt == 0
    steps = B // bt

    # ---- BN batch statistics, once, in XLA (trivial reduction).
    mean = jnp.mean(x, axis=(0, 2))                                    # (F,)
    var = jnp.mean(jnp.square(x - mean[None, :, None]), axis=(0, 2))   # biased
    inv_std = jax.lax.rsqrt(var + EPS)
    mean3 = mean.reshape(1, F, 1).astype(jnp.float32)
    inv_std3 = inv_std.reshape(1, F, 1).astype(jnp.float32)

    # ---- Reorder QKV weight columns to [all-Q | all-K | all-V] (head-grouped)
    #      and fold 1/sqrt(Dh) into the Q columns / Q bias.
    scale = 1.0 / math.sqrt(Dh)
    gscale = jnp.array([scale, 1.0, 1.0], dtype=jnp.float32)
    w4 = w_qkv.reshape(H, 3, Dh, E).transpose(1, 0, 2, 3)              # (3, H, Dh, E)
    w4 = w4 * gscale[:, None, None, None]
    w_t = jnp.transpose(w4.reshape(3 * E, E))                          # (E, 3E)
    b3 = b_qkv.reshape(H, 3, Dh).transpose(1, 0, 2) * gscale[:, None, None]
    bias = b3.reshape(1, 3 * E)

    # ---- Explicit VMEM budget from the actual resident set (x/out blocks
    #      double-buffered + W + bias + stats), with headroom.
    itemsize = 4
    resident = (2 * 2 * bt * F * E          # x block + out block, double-buffered
                + E * 3 * E + 3 * E         # W + bias
                + 2 * F) * itemsize         # mean + inv_std
    vmem_limit = int(min(64 * 1024 * 1024, max(4 * 1024 * 1024, 4 * resident)))

    kernel = functools.partial(_fused_mhsa_kernel, num_heads=H, head_dim=Dh)
    out = pl.pallas_call(
        kernel,
        out_shape=jax.ShapeDtypeStruct((B, F, E), x.dtype),
        grid=(steps,),
        in_specs=[
            pl.BlockSpec((bt, F, E), lambda i: (i, 0, 0)),      # x batch tile
            pl.BlockSpec((1, F, 1), lambda i: (0, 0, 0)),       # BN mean (resident)
            pl.BlockSpec((1, F, 1), lambda i: (0, 0, 0)),       # BN inv_std (resident)
            pl.BlockSpec((E, 3 * E), lambda i: (0, 0)),         # W.T, reordered (resident)
            pl.BlockSpec((1, 3 * E), lambda i: (0, 0)),         # bias, reordered (resident)
        ],
        out_specs=pl.BlockSpec((bt, F, E), lambda i: (i, 0, 0)),
        compiler_params=pltpu.CompilerParams(
            dimension_semantics=("parallel",),
            vmem_limit_bytes=vmem_limit),
    )(x, mean3, inv_std3, w_t, bias)
    return out


# ---------------------------------------------------------------------------
# Pure-JAX reference (mirrors the PyTorch forward) for a correctness check.
# ---------------------------------------------------------------------------
def reference(x, w_qkv, b_qkv, num_heads):
    B, F, E = x.shape
    H = num_heads
    Dh = E // H
    mean = jnp.mean(x, axis=(0, 2), keepdims=True)
    var = jnp.mean((x - mean) ** 2, axis=(0, 2), keepdims=True)
    xn = (x - mean) / jnp.sqrt(var + EPS)
    qkv = xn @ w_qkv.T + b_qkv                               # (B, F, 3E)
    qkv = qkv.reshape(B, F, H, 3 * Dh).transpose(0, 2, 1, 3)
    q, k, v = jnp.split(qkv, 3, axis=-1)
    logits = jnp.einsum("bhqd,bhkd->bhqk", q, k) / jnp.sqrt(jnp.float32(Dh))
    attn = jax.nn.softmax(logits, axis=-1)
    vals = jnp.einsum("bhqk,bhkd->bhqd", attn, v)
    return vals.transpose(0, 2, 1, 3).reshape(B, F, E)


if __name__ == "__main__":
    # Shapes consistent with the module: batch=2, features_dim=16,
    # embedding_dim=32, num_heads=4 (head_dim=8).
    B, F, E, H = 2, 16, 32, 4

    key = jax.random.PRNGKey(0)
    kx, kw = jax.random.split(key)

    x = jax.random.normal(kx, (B, F, E), dtype=jnp.float32)

    # Deterministic parameter init matching the module's _reset_parameters():
    # xavier_uniform_ for the (3E, E) Linear weight, zeros for the bias.
    bound = math.sqrt(6.0 / (E + 3 * E))
    w_qkv = jax.random.uniform(kw, (3 * E, E), dtype=jnp.float32,
                               minval=-bound, maxval=bound)
    b_qkv = jnp.zeros((3 * E,), dtype=jnp.float32)

    out = multihead_self_attention(x, w_qkv, b_qkv, H)
    out = jax.block_until_ready(out)

    ref = reference(x, w_qkv, b_qkv, H)
    assert out.shape == (B, F, E)
    # Tolerance allows for the approximate (EUP) reciprocal in the softmax.
    assert jnp.allclose(out, ref, atol=1e-2, rtol=1e-2), (
        f"max abs diff {jnp.max(jnp.abs(out - ref))}")

    print("KERNEL_OK")
</pallas_src>

<mosaic_0001>
module attributes {stable_mosaic.version = 11 : i64} {
  func.func @_fused_mhsa_kernel(%arg0: i32, %arg1: memref<2x16x32xf32, #tpu.memory_space<vmem>>, %arg2: memref<1x16x1xf32, #tpu.memory_space<vmem>>, %arg3: memref<1x16x1xf32, #tpu.memory_space<vmem>>, %arg4: memref<32x96xf32, #tpu.memory_space<vmem>>, %arg5: memref<1x96xf32, #tpu.memory_space<vmem>>, %arg6: memref<2x16x32xf32, #tpu.memory_space<vmem>>) attributes {dimension_semantics = [#tpu.dimension_semantics<parallel>], iteration_bounds = array<i64: 1>, scalar_prefetch = 0 : i64, scratch_operands = 0 : i64, tpu.core_type = #tpu.core_type<tc>, window_params = [{transform_indices = @transform_0, window_bounds = array<i64: 2, 16, 32>}, {pipeline_mode = #tpu.pipeline_mode<synchronous>, transform_indices = @transform_1, window_bounds = array<i64: 1, 16, 1>}, {pipeline_mode = #tpu.pipeline_mode<synchronous>, transform_indices = @transform_2, window_bounds = array<i64: 1, 16, 1>}, {pipeline_mode = #tpu.pipeline_mode<synchronous>, transform_indices = @transform_3, window_bounds = array<i64: 32, 96>}, {pipeline_mode = #tpu.pipeline_mode<synchronous>, transform_indices = @transform_4, window_bounds = array<i64: 1, 96>}, {transform_indices = @transform_5, window_bounds = array<i64: 2, 16, 32>}]} {
    %c0 = arith.constant 0 : index
    %c0_0 = arith.constant 0 : index
    %c0_1 = arith.constant 0 : index
    %0 = vector.load %arg1[%c0, %c0_0, %c0_1] : memref<2x16x32xf32, #tpu.memory_space<vmem>>, vector<2x16x32xf32>
    %c0_2 = arith.constant 0 : index
    %c0_3 = arith.constant 0 : index
    %c0_4 = arith.constant 0 : index
    %1 = vector.load %arg2[%c0_2, %c0_3, %c0_4] : memref<1x16x1xf32, #tpu.memory_space<vmem>>, vector<1x16x1xf32>
    %c0_5 = arith.constant 0 : index
    %c0_6 = arith.constant 0 : index
    %c0_7 = arith.constant 0 : index
    %2 = vector.load %arg3[%c0_5, %c0_6, %c0_7] : memref<1x16x1xf32, #tpu.memory_space<vmem>>, vector<1x16x1xf32>
    %3 = vector.broadcast %1 : vector<1x16x1xf32> to vector<2x16x32xf32>
    %4 = arith.subf %0, %3 : vector<2x16x32xf32>
    %5 = vector.broadcast %2 : vector<1x16x1xf32> to vector<2x16x32xf32>
    %6 = arith.mulf %4, %5 : vector<2x16x32xf32>
    %7 = vector.shape_cast %6 : vector<2x16x32xf32> to vector<32x32xf32>
    %c0_8 = arith.constant 0 : index
    %c0_9 = arith.constant 0 : index
    %8 = vector.load %arg4[%c0_8, %c0_9] : memref<32x96xf32, #tpu.memory_space<vmem>>, vector<32x96xf32>
    %c0_10 = arith.constant 0 : index
    %c0_11 = arith.constant 0 : index
    %9 = vector.load %arg5[%c0_10, %c0_11] : memref<1x96xf32, #tpu.memory_space<vmem>>, vector<1x96xf32>
    %cst = arith.constant dense<0.000000e+00> : vector<32x96xf32>
    %10 = tpu.matmul %7, %8, %cst {dimension_numbers = #tpu.dot_dimension_numbers<[1], [0], [0], [1], [0, 0, 1, 1], [], []>} : vector<32x32xf32>, vector<32x96xf32>, vector<32x96xf32> -> vector<32x96xf32>
    %11 = vector.broadcast %9 : vector<1x96xf32> to vector<32x96xf32>
    %12 = arith.addf %10, %11 : vector<32x96xf32>
    %13 = vector.shape_cast %12 : vector<32x96xf32> to vector<2x16x96xf32>
    %14 = vector.extract_strided_slice %13 {offsets = [0, 0, 0], sizes = [2, 16, 8], strides = [1, 1, 1]} : vector<2x16x96xf32> to vector<2x16x8xf32>
    %15 = vector.extract_strided_slice %13 {offsets = [0, 0, 32], sizes = [2, 16, 8], strides = [1, 1, 1]} : vector<2x16x96xf32> to vector<2x16x8xf32>
    %16 = vector.extract_strided_slice %13 {offsets = [0, 0, 64], sizes = [2, 16, 8], strides = [1, 1, 1]} : vector<2x16x96xf32> to vector<2x16x8xf32>
    "tpu.trace_start"() <{level = 10 : i32, message = "bqd,bkd->bqk"}> : () -> ()
    %cst_12 = arith.constant dense<0.000000e+00> : vector<2x16x16xf32>
    %17 = tpu.matmul %14, %15, %cst_12 {dimension_numbers = #tpu.dot_dimension_numbers<[2], [2], [1], [1], [0, 0, 0, 1, 1, 1], [0], [0]>} : vector<2x16x8xf32>, vector<2x16x8xf32>, vector<2x16x16xf32> -> vector<2x16x16xf32>
    "tpu.trace_stop"() : () -> ()
    %cst_13 = arith.constant dense<0xFF800000> : vector<2x16xf32>
    %18 = vector.multi_reduction <maximumf>, %17, %cst_13 [2] : vector<2x16x16xf32> to vector<2x16xf32>
    %19 = vector.shape_cast %18 : vector<2x16xf32> to vector<2x16x1xf32>
    %20 = vector.broadcast %19 : vector<2x16x1xf32> to vector<2x16x16xf32>
    %21 = arith.subf %17, %20 : vector<2x16x16xf32>
    %22 = math.exp %21 : vector<2x16x16xf32>
    %cst_14 = arith.constant dense<0.000000e+00> : vector<2x16xf32>
    %23 = vector.multi_reduction <add>, %22, %cst_14 [2] : vector<2x16x16xf32> to vector<2x16xf32>
    %24 = vector.shape_cast %23 : vector<2x16xf32> to vector<2x16x1xf32>
    %25 = tpu.reciprocal %24 {approx = true} : vector<2x16x1xf32> -> vector<2x16x1xf32>
    %26 = vector.broadcast %25 : vector<2x16x1xf32> to vector<2x16x16xf32>
    %27 = arith.mulf %22, %26 : vector<2x16x16xf32>
    "tpu.trace_start"() <{level = 10 : i32, message = "bqk,bkd->bqd"}> : () -> ()
    %cst_15 = arith.constant dense<0.000000e+00> : vector<2x16x8xf32>
    %28 = tpu.matmul %27, %16, %cst_15 {dimension_numbers = #tpu.dot_dimension_numbers<[2], [1], [1], [2], [0, 0, 0, 1, 1, 2], [0], [0]>} : vector<2x16x16xf32>, vector<2x16x8xf32>, vector<2x16x8xf32> -> vector<2x16x8xf32>
    "tpu.trace_stop"() : () -> ()
    %29 = vector.extract_strided_slice %13 {offsets = [0, 0, 8], sizes = [2, 16, 8], strides = [1, 1, 1]} : vector<2x16x96xf32> to vector<2x16x8xf32>
    %30 = vector.extract_strided_slice %13 {offsets = [0, 0, 40], sizes = [2, 16, 8], strides = [1, 1, 1]} : vector<2x16x96xf32> to vector<2x16x8xf32>
    %31 = vector.extract_strided_slice %13 {offsets = [0, 0, 72], sizes = [2, 16, 8], strides = [1, 1, 1]} : vector<2x16x96xf32> to vector<2x16x8xf32>
    "tpu.trace_start"() <{level = 10 : i32, message = "bqd,bkd->bqk"}> : () -> ()
    %cst_16 = arith.constant dense<0.000000e+00> : vector<2x16x16xf32>
    %32 = tpu.matmul %29, %30, %cst_16 {dimension_numbers = #tpu.dot_dimension_numbers<[2], [2], [1], [1], [0, 0, 0, 1, 1, 1], [0], [0]>} : vector<2x16x8xf32>, vector<2x16x8xf32>, vector<2x16x16xf32> -> vector<2x16x16xf32>
    "tpu.trace_stop"() : () -> ()
    %cst_17 = arith.constant dense<0xFF800000> : vector<2x16xf32>
    %33 = vector.multi_reduction <maximumf>, %32, %cst_17 [2] : vector<2x16x16xf32> to vector<2x16xf32>
    %34 = vector.shape_cast %33 : vector<2x16xf32> to vector<2x16x1xf32>
    %35 = vector.broadcast %34 : vector<2x16x1xf32> to vector<2x16x16xf32>
    %36 = arith.subf %32, %35 : vector<2x16x16xf32>
    %37 = math.exp %36 : vector<2x16x16xf32>
    %cst_18 = arith.constant dense<0.000000e+00> : vector<2x16xf32>
    %38 = vector.multi_reduction <add>, %37, %cst_18 [2] : vector<2x16x16xf32> to vector<2x16xf32>
    %39 = vector.shape_cast %38 : vector<2x16xf32> to vector<2x16x1xf32>
    %40 = tpu.reciprocal %39 {approx = true} : vector<2x16x1xf32> -> vector<2x16x1xf32>
    %41 = vector.broadcast %40 : vector<2x16x1xf32> to vector<2x16x16xf32>
    %42 = arith.mulf %37, %41 : vector<2x16x16xf32>
    "tpu.trace_start"() <{level = 10 : i32, message = "bqk,bkd->bqd"}> : () -> ()
    %cst_19 = arith.constant dense<0.000000e+00> : vector<2x16x8xf32>
    %43 = tpu.matmul %42, %31, %cst_19 {dimension_numbers = #tpu.dot_dimension_numbers<[2], [1], [1], [2], [0, 0, 0, 1, 1, 2], [0], [0]>} : vector<2x16x16xf32>, vector<2x16x8xf32>, vector<2x16x8xf32> -> vector<2x16x8xf32>
    "tpu.trace_stop"() : () -> ()
    %44 = vector.extract_strided_slice %13 {offsets = [0, 0, 16], sizes = [2, 16, 8], strides = [1, 1, 1]} : vector<2x16x96xf32> to vector<2x16x8xf32>
    %45 = vector.extract_strided_slice %13 {offsets = [0, 0, 48], sizes = [2, 16, 8], strides = [1, 1, 1]} : vector<2x16x96xf32> to vector<2x16x8xf32>
    %46 = vector.extract_strided_slice %13 {offsets = [0, 0, 80], sizes = [2, 16, 8], strides = [1, 1, 1]} : vector<2x16x96xf32> to vector<2x16x8xf32>
    "tpu.trace_start"() <{level = 10 : i32, message = "bqd,bkd->bqk"}> : () -> ()
    %cst_20 = arith.constant dense<0.000000e+00> : vector<2x16x16xf32>
    %47 = tpu.matmul %44, %45, %cst_20 {dimension_numbers = #tpu.dot_dimension_numbers<[2], [2], [1], [1], [0, 0, 0, 1, 1, 1], [0], [0]>} : vector<2x16x8xf32>, vector<2x16x8xf32>, vector<2x16x16xf32> -> vector<2x16x16xf32>
    "tpu.trace_stop"() : () -> ()
    %cst_21 = arith.constant dense<0xFF800000> : vector<2x16xf32>
    %48 = vector.multi_reduction <maximumf>, %47, %cst_21 [2] : vector<2x16x16xf32> to vector<2x16xf32>
    %49 = vector.shape_cast %48 : vector<2x16xf32> to vector<2x16x1xf32>
    %50 = vector.broadcast %49 : vector<2x16x1xf32> to vector<2x16x16xf32>
    %51 = arith.subf %47, %50 : vector<2x16x16xf32>
    %52 = math.exp %51 : vector<2x16x16xf32>
    %cst_22 = arith.constant dense<0.000000e+00> : vector<2x16xf32>
    %53 = vector.multi_reduction <add>, %52, %cst_22 [2] : vector<2x16x16xf32> to vector<2x16xf32>
    %54 = vector.shape_cast %53 : vector<2x16xf32> to vector<2x16x1xf32>
    %55 = tpu.reciprocal %54 {approx = true} : vector<2x16x1xf32> -> vector<2x16x1xf32>
    %56 = vector.broadcast %55 : vector<2x16x1xf32> to vector<2x16x16xf32>
    %57 = arith.mulf %52, %56 : vector<2x16x16xf32>
    "tpu.trace_start"() <{level = 10 : i32, message = "bqk,bkd->bqd"}> : () -> ()
    %cst_23 = arith.constant dense<0.000000e+00> : vector<2x16x8xf32>
    %58 = tpu.matmul %57, %46, %cst_23 {dimension_numbers = #tpu.dot_dimension_numbers<[2], [1], [1], [2], [0, 0, 0, 1, 1, 2], [0], [0]>} : vector<2x16x16xf32>, vector<2x16x8xf32>, vector<2x16x8xf32> -> vector<2x16x8xf32>
    "tpu.trace_stop"() : () -> ()
    %59 = vector.extract_strided_slice %13 {offsets = [0, 0, 24], sizes = [2, 16, 8], strides = [1, 1, 1]} : vector<2x16x96xf32> to vector<2x16x8xf32>
    %60 = vector.extract_strided_slice %13 {offsets = [0, 0, 56], sizes = [2, 16, 8], strides = [1, 1, 1]} : vector<2x16x96xf32> to vector<2x16x8xf32>
    %61 = vector.extract_strided_slice %13 {offsets = [0, 0, 88], sizes = [2, 16, 8], strides = [1, 1, 1]} : vector<2x16x96xf32> to vector<2x16x8xf32>
    "tpu.trace_start"() <{level = 10 : i32, message = "bqd,bkd->bqk"}> : () -> ()
    %cst_24 = arith.constant dense<0.000000e+00> : vector<2x16x16xf32>
    %62 = tpu.matmul %59, %60, %cst_24 {dimension_numbers = #tpu.dot_dimension_numbers<[2], [2], [1], [1], [0, 0, 0, 1, 1, 1], [0], [0]>} : vector<2x16x8xf32>, vector<2x16x8xf32>, vector<2x16x16xf32> -> vector<2x16x16xf32>
    "tpu.trace_stop"() : () -> ()
    %cst_25 = arith.constant dense<0xFF800000> : vector<2x16xf32>
    %63 = vector.multi_reduction <maximumf>, %62, %cst_25 [2] : vector<2x16x16xf32> to vector<2x16xf32>
    %64 = vector.shape_cast %63 : vector<2x16xf32> to vector<2x16x1xf32>
    %65 = vector.broadcast %64 : vector<2x16x1xf32> to vector<2x16x16xf32>
    %66 = arith.subf %62, %65 : vector<2x16x16xf32>
    %67 = math.exp %66 : vector<2x16x16xf32>
    %cst_26 = arith.constant dense<0.000000e+00> : vector<2x16xf32>
    %68 = vector.multi_reduction <add>, %67, %cst_26 [2] : vector<2x16x16xf32> to vector<2x16xf32>
    %69 = vector.shape_cast %68 : vector<2x16xf32> to vector<2x16x1xf32>
    %70 = tpu.reciprocal %69 {approx = true} : vector<2x16x1xf32> -> vector<2x16x1xf32>
    %71 = vector.broadcast %70 : vector<2x16x1xf32> to vector<2x16x16xf32>
    %72 = arith.mulf %67, %71 : vector<2x16x16xf32>
    "tpu.trace_start"() <{level = 10 : i32, message = "bqk,bkd->bqd"}> : () -> ()
    %cst_27 = arith.constant dense<0.000000e+00> : vector<2x16x8xf32>
    %73 = tpu.matmul %72, %61, %cst_27 {dimension_numbers = #tpu.dot_dimension_numbers<[2], [1], [1], [2], [0, 0, 0, 1, 1, 2], [0], [0]>} : vector<2x16x16xf32>, vector<2x16x8xf32>, vector<2x16x8xf32> -> vector<2x16x8xf32>
    "tpu.trace_stop"() : () -> ()
    %74 = tpu.concatenate %28, %43, %58, %73 in 2 : vector<2x16x8xf32>, vector<2x16x8xf32>, vector<2x16x8xf32>, vector<2x16x8xf32> -> vector<2x16x32xf32>
    %c0_28 = arith.constant 0 : index
    %c0_29 = arith.constant 0 : index
    %c0_30 = arith.constant 0 : index
    %75 = vector.load %arg6[%c0_28, %c0_29, %c0_30] : memref<2x16x32xf32, #tpu.memory_space<vmem>>, vector<2x16x32xf32>
    tpu.vector_store %arg6[%c0_28, %c0_29, %c0_30], %74 {strides = array<i32>} : memref<2x16x32xf32, #tpu.memory_space<vmem>>, vector<2x16x32xf32>,
    return
  }
  func.func @transform_0(%arg0: i32) -> (i32, i32, i32) {
    %c0_i32 = arith.constant 0 : i32
    %c0_i32_0 = arith.constant 0 : i32
    %c0_i32_1 = arith.constant 0 : i32
    return %arg0, %c0_i32, %c0_i32_0 : i32, i32, i32
  }
  func.func @transform_1(%arg0: i32) -> (i32, i32, i32) {
    %c0_i32 = arith.constant 0 : i32
    %c0_i32_0 = arith.constant 0 : i32
    %c0_i32_1 = arith.constant 0 : i32
    %c0_i32_2 = arith.constant 0 : i32
    return %c0_i32, %c0_i32_0, %c0_i32_1 : i32, i32, i32
  }
  func.func @transform_2(%arg0: i32) -> (i32, i32, i32) {
    %c0_i32 = arith.constant 0 : i32
    %c0_i32_0 = arith.constant 0 : i32
    %c0_i32_1 = arith.constant 0 : i32
    %c0_i32_2 = arith.constant 0 : i32
    return %c0_i32, %c0_i32_0, %c0_i32_1 : i32, i32, i32
  }
  func.func @transform_3(%arg0: i32) -> (i32, i32) {
    %c0_i32 = arith.constant 0 : i32
    %c0_i32_0 = arith.constant 0 : i32
    %c0_i32_1 = arith.constant 0 : i32
    return %c0_i32, %c0_i32_0 : i32, i32
  }
  func.func @transform_4(%arg0: i32) -> (i32, i32) {
    %c0_i32 = arith.constant 0 : i32
    %c0_i32_0 = arith.constant 0 : i32
    %c0_i32_1 = arith.constant 0 : i32
    return %c0_i32, %c0_i32_0 : i32, i32
  }
  func.func @transform_5(%arg0: i32) -> (i32, i32, i32) {
    %c0_i32 = arith.constant 0 : i32
    %c0_i32_0 = arith.constant 0 : i32
    %c0_i32_1 = arith.constant 0 : i32
    return %arg0, %c0_i32, %c0_i32_0 : i32, i32, i32
  }
}

</mosaic_0001>

<bundles_post_ra>
// kernel: tpu_custom_call.1
= control target key start
LH: loop header
LB: loop body
LE: loop exit
PB: predicated region body
PF: predicated region fallthrough
CT: control target
= control target key end

     0   :  { %10 = vsyncpa [#allocation3], 0  ;;  %s2720_s0 = inlined_call_operand.vmem [shape: f32[2,16,32], index: 0, kind: input, shape index: {}]   ;;  %s2721_s1 = inlined_call_operand.vmem [shape: f32[1,16,1], index: 1, kind: input, shape index: {}]   ;;  %s2722_s2 = inlined_call_operand.vmem [shape: f32[1,16,1], index: 2, kind: input, shape index: {}]   ;;  %s2723_s3 = inlined_call_operand.hbm [shape: f32[32,96], index: 3, kind: input, shape index: {}]   ;;  %s2724_s4 = inlined_call_operand.vmem [shape: f32[1,96], index: 4, kind: input, shape index: {}]   ;;  %s2725_s5 = inlined_call_operand.hbm [shape: f32[2,16,32], index: 5, kind: output, shape index: {}]  }
   0x1   :  { %11 = vsyncpa [#allocation4], 0  ;;  %s2411_s18 = smov [#allocation2]   ;;  %s2363_s22 = scalar_lea.hbm %s2723_s3, 512 }
   0x2   :  { %s23_s19 = sshll.u32 %s2411_s18, 4  ;;  %p2364_p0 = scmp.ne.s32.totalorder %s2723_s3, %s2363_s22  ;;  %s24_s19 = int_to_ptr.vmem [resolvable:$true] %s23_s19 }
   0x3   :  { %p2367_p1 = scmp.lt.u32.totalorder %s2363_s22, %s2723_s3 }
   0x5   :  { %p2369_p2 = pnand %p2367_p1, %p2364_p0 }
   0x7   :  { %2372 = shalt.err (!%p2369_p2)
}
   0x8   :  { %s2373_s27 = scalar_lea.vmem %s24_s19, 512  ;;  %p2378_p4 = scmp.lt.s32.totalorder %s24_s19, %s24_s19 }
   0x9   :  { %p2374_p3 = scmp.ne.s32.totalorder %s24_s19, %s2373_s27  ;;  %p2379_p5 = scmp.lt.s32.totalorder %s2373_s27, %s2373_s27 }
   0xb   :  { %p2380_p6 = por %p2379_p5, %p2378_p4 }
   0xd   :  { %p2381_p7 = pnand %p2380_p6, %p2374_p3 }
   0xf   :  { %2384 = shalt.err (!%p2381_p7)
}
  0x10   :  { %s2412_s28 = smov 128   ;;  %s2413_s29 = smov 8  }
  0x11   :  { %29 = dma.hbm_to_vmem [thread:$0]  %s2723_s3, 512, %s24_s19, [#allocation3], %s2412_s28, %s2412_s28, %s2413_s29  }
  0x12   :  { %2407 = dma.done.wait [#allocation3], 512  }
  0x13   :  { %2408 = vsyncadd [#allocation3], 4294966784  ;;  %v2414_v0 = vmov 0   ;;  %v41_v1 = vld [vmem:[%s2722_s2] sm:$0xff]  ;;  %v42_v3 = vld [vmem:[%s2722_s2 + $0x8] sm:$0xff]  ;;  %vm82_vm0 = vcmask 261120  }
  0x14   :  { %2218 = vset.pattern.permute.xlu1 %v2414_v0  ;;  %2217 = vset.pattern.permute.xlu0 %v2414_v0  ;;  %v39_v2 = vld [vmem:[%s2721_s1] sm:$0xff]  ;;  %v40_v4 = vld [vmem:[%s2721_s1 + $0x8] sm:$0xff]  ;;  %v73_v7 = vld [vmem:[#allocation2 + $0x10] sm:$0xff]  ;;  %vm186_vm1 = vcmask 64512   ;;  %vm359_vm3 = vcmask 130048   ;;  %s2417_s22 = smov 88  }
  0x15   :  { %59 = vperm.xlu1 %2218, %v41_v1   ;;  %45 = vperm.xlu0 %2217, %v39_v2   ;;  %v71_v5 = vld [vmem:[#allocation2] sm:$0xff]  ;;  %v72_v6 = vld [vmem:[#allocation2 + $0x8] sm:$0xff]  ;;  %v74_v9 = vld [vmem:[#allocation2 + $0x18] sm:$0xff]  ;;  %s2418_s23 = smov 120   ;;  %s2419_s24 = smov 56   ;;  %vm1834_vm4 = vcmask 195584  }
  0x16   :  { %v2111_v8 = vpack.c.bf16 %v72_v6, %v71_v5  ;;  %v2115_v10 = vpack.c.bf16 %v74_v9, %v73_v7  ;;  %v35_v11 = vld [vmem:[%s2720_s0] sm:$0xff]  ;;  %v37_v14 = vld [vmem:[%s2720_s0 + $0x10] sm:$0xff]  ;;  %v36_v16 = vld [vmem:[%s2720_s0 + $0x8] sm:$0xff]  ;;  %s2420_s25 = smov 80   ;;  %s2421_s26 = smov 112  }
  0x17   :  { %v38_v20 = vld [vmem:[%s2720_s0 + $0x18] sm:$0xff]  ;;  %v1860_v27 = vld [vmem:[%s2724_s4] ss:$0 sm:$0xff]  ;;  %s2415_s0 = smov 96   ;;  %vm2529_vm2 = vmpackc.low %vm186_vm1, %vm186_vm1  ;;  %s2416_s4 = smov 64  }
  0x18   :  { %2112 = vmatprep.subr.bf16.mxu0 %v2111_v8  ;;  %s2422_s27 = smov 48   ;;  %s2423_s30 = smov 72  }
  0x19   :  { %64 = vperm.xlu1 %2218, %v42_v3   ;;  %50 = vperm.xlu0 %2217, %v40_v4   ;;  %s2424_s6 = smov 104   ;;  %s2425_s7 = smov 40  }
  0x1a   :  { %2114 = vmatpush3.bf16.msra.mxu0 %v2111_v8  ;;  %s2426_s8 = smov 16   ;;  %s2427_s9 = smov 24  }
  0x1b   :  { %2116 = vmatprep.subr.bf16.mxu0 %v2115_v10  ;;  %s2428_s10 = smov [#allocation5]  }
  0x1c   :  { %s1848_s11 = sshll.u32 %s2428_s10, 4  ;;  %s1849_s11 = int_to_ptr.vmem [resolvable:$true] %s1848_s11 }
  0x1d   :  { %s2385_s12 = scalar_lea.vmem %s1849_s11, 512  ;;  %p2390_p9 = scmp.lt.s32.totalorder %s1849_s11, %s1849_s11 }
  0x1e   :  { %2118 = vmatpush3.bf16.msra.mxu0 %v2115_v10  ;;  %p2386_p8 = scmp.ne.s32.totalorder %s1849_s11, %s2385_s12  ;;  %p2391_p10 = scmp.lt.s32.totalorder %s2385_s12, %s2385_s12 }
  0x20   :  { %p2392_p11 = por %p2391_p10, %p2390_p9 }
  0x22   :  { %p2393_p12 = pnand %p2392_p11, %p2386_p8 }
  0x94   :  { %v60_v12 = vpop.permute.xlu1 %59  ;;  %v46_v13 = vpop.permute.xlu0 %45 }
  0x95   :  { %v53_v15 = vsub.f32 %v35_v11, %v46_v13  ;;  %v55_v18 = vsub.f32 %v37_v14, %v46_v13 }
  0x97   :  { %v67_v17 = vmul.f32 %v60_v12, %v53_v15  ;;  %v69_v25 = vmul.f32 %v60_v12, %v55_v18 }
  0x98   :  { %v51_v19 = vpop.permute.xlu0 %50  ;;  %v65_v22 = vpop.permute.xlu1 %64 }
  0x99   :  { %v54_v21 = vsub.f32 %v36_v16, %v51_v19  ;;  %1993 = vmatprep.mubr.msk.f32.mxu0 %vm82_vm0, %v67_v17  ;;  %v56_v23 = vsub.f32 %v38_v20, %v51_v19 }
  0x9b   :  { %v68_v24 = vmul.f32 %v65_v22, %v54_v21  ;;  %v70_v26 = vmul.f32 %v65_v22, %v56_v23 }
  0x9d   :  { %1994 = vmatmul.mubr.msk.f32.vlgmr.msra.gmra.mrb[0].mxu0 %vm82_vm0, %v68_v24 }
  0x9e   :  { %1996 = vmatprep.mubr.msk.f32.mxu0 %vm82_vm0, %v69_v25 }
  0xa1   :  { %1997 = vmatmul.mubr.msk.f32.gmra.mrb[2].mxu0 %vm82_vm0, %v70_v26 }
 0x170   :  { %v1995_v28 = vpop.f32.mrb[0].mxu0 }
 0x171   :  { %v2505_v29 = vadd.f32 %v1995_v28, %v1860_v27  ;;  %v161_v30 = vpop.f32.mrb[1].mxu0 }
 0x172   :  { %v2507_v31 = vadd.f32 %v1860_v27, %v161_v30 }
 0x174   :  { %v1998_v32 = vpop.f32.mrb[2].mxu0  ;;  %2003 = vmatprep.mubr.msk.f32.mxu1 %vm186_vm1, %v2507_v31  ;;  %v2513_v33 = vpack.i.bf16 %v2505_v29, %v2507_v31 }
 0x175   :  { %v2515_v34 = vadd.f32 %v1998_v32, %v1860_v27  ;;  %v171_v35 = vpop.f32.mrb[3].mxu0 }
 0x176   :  { %v2517_v36 = vadd.f32 %v1860_v27, %v171_v35  ;;  %2220 = vrot.lane.b32.xlu0 %v2513_v33, %s2415_s0 }
 0x178   :  { %2010 = vmatprep.mubr.msk.f32.mxu0 %vm186_vm1, %v2517_v36  ;;  %v2524_v37 = vpack.i.bf16 %v2515_v34, %v2517_v36 }
 0x17a   :  { %2225 = vrot.lane.b32.xlu1 %v2524_v37, %s2415_s0 }
 0x1e8   :  { %v2221_v38 = vpop.permute.xlu0 %2220 }
 0x1e9   :  { %v2223_v39 = vunpack.i.h.bf16 %v2221_v38  ;;  %v2222_v40 = vunpack.i.l.bf16 %v2221_v38 }
 0x1eb   :  { %v2119_v42 = vpack.c.bf16 %v2223_v39, %v2222_v40 }
 0x1ec   :  { %v2226_v43 = vpop.permute.xlu1 %2225 }
 0x1ed   :  { %v2228_v44 = vunpack.i.h.bf16 %v2226_v43  ;;  %v2227_v45 = vunpack.i.l.bf16 %v2226_v43  ;;  %2121 = vmatprep.subr.msk.bf16.mxu1 %vm2529_vm2, %v2119_v42 }
 0x1ee   :  { %2124 = vmatpush3.bf16.xpose.msk.msra.mxu1 %vm2529_vm2, %v2119_v42 }
 0x1ef   :  { %v2125_v46 = vpack.c.bf16 %v2228_v44, %v2227_v45 }
 0x1f1   :  { %2127 = vmatprep.subr.msk.bf16.mxu0 %vm2529_vm2, %v2125_v46 }
 0x1f2   :  { %2130 = vmatpush3.bf16.xpose.msk.msra.mxu0 %vm2529_vm2, %v2125_v46 }
 0x1f5   :  { %2004 = vmatmul.mubr.msk.f32.vlgmr.msra.gmra.mrb[0].mxu1 %vm186_vm1, %v2505_v29 }
 0x1f9   :  { %2011 = vmatmul.mubr.msk.f32.vlgmr.msra.gmra.mrb[4].mxu0 %vm186_vm1, %v2515_v34 }
 0x2c8   :  { %v2005_v47 = vpop.f32.mrb[0].mxu1 }
 0x2c9   :  { %v261_v48 = vpop.f32.mrb[1].mxu1  ;;  %v363_v49 = vsel %vm359_vm3, %v2005_v47, -inf }
 0x2ca   :  { %364 = vmax.xlane.f32.xlu1 %v363_v49  ;;  %v360_v50 = vsel %vm359_vm3, %v261_v48, -inf }
 0x2cb   :  { %361 = vmax.xlane.f32.xlu0 %v360_v50 }
 0x2cc   :  { %v2012_v51 = vpop.f32.mrb[4].mxu0 }
 0x2cd   :  { %v350_v52 = vpop.f32.mrb[5].mxu0  ;;  %v369_v54 = vsel %vm359_vm3, %v2012_v51, -inf }
 0x2ce   :  { %v366_v53 = vsel %vm359_vm3, %v350_v52, -inf }
 0x2cf   :  { %367 = vmax.xlane.f32.xlu0 %v366_v53 }
 0x2d3   :  { %370 = vmax.xlane.f32.xlu0 %v369_v54 }
 0x2db   :  { %2230 = vrot.lane.b32.xlu1 %v2513_v33, %s2416_s4 }
 0x2df   :  { %2240 = vrot.lane.b32.xlu1 %v2513_v33, %s2417_s22 }
 0x2e3   :  { %2245 = vrot.lane.b32.xlu1 %v2524_v37, %s2417_s22 }
 0x357   :  { %v365_v55 = vpop.xlane.xlu1 %364 }
 0x358   :  { %v373_v56 = vsub.f32 %v2005_v47, %v365_v55  ;;  %v362_v57 = vpop.xlane.xlu0 %361 }
 0x359   :  { %v372_v58 = vsub.f32 %v261_v48, %v362_v57 }
 0x35a   :  { %v378_v59 = vmul.f32 1.442695, %v373_v56 }
 0x35b   :  { %v376_v60 = vmul.f32 1.442695, %v372_v58  ;;  %v2231_v61 = vpop.permute.xlu1 %2230 }
 0x35c   :  { %2299 = vpow2.f32 %v378_v59  ;;  %v2233_v62 = vunpack.i.h.bf16 %v2231_v61  ;;  %v2232_v63 = vunpack.i.l.bf16 %v2231_v61  ;;  %v368_v9 = vpop.xlane.xlu0 %367 }
 0x35d   :  { %2301 = vpow2.f32 %v376_v60  ;;  %v374_v12 = vsub.f32 %v350_v52, %v368_v9 }
 0x35e   :  { %v2131_v0 = vpack.c.bf16 %v2233_v62, %v2232_v63 }
 0x35f   :  { %v2241_v1 = vpop.permute.xlu1 %2240  ;;  %v380_v14 = vmul.f32 1.442695, %v374_v12 }
 0x360   :  { %v2243_v2 = vunpack.i.h.bf16 %v2241_v1  ;;  %v2242_v3 = vunpack.i.l.bf16 %v2241_v1  ;;  %2132 = vmatprep.subr.bf16.mxu1 %v2131_v0  ;;  %v371_v10 = vpop.xlane.xlu0 %370 }
 0x361   :  { %2134 = vmatpush3.bf16.msra.mxu1 %v2131_v0  ;;  %v375_v11 = vsub.f32 %v2012_v51, %v371_v10 }
 0x362   :  { %v2139_v4 = vpack.c.bf16 %v2243_v2, %v2242_v3 }
 0x363   :  { %v382_v13 = vmul.f32 1.442695, %v375_v11  ;;  %v2246_v19 = vpop.permute.xlu1 %2245 }
 0x364   :  { %2141 = vmatprep.subr.msk.bf16.mxu0 %vm2529_vm2, %v2139_v4  ;;  %v2248_v28 = vunpack.i.h.bf16 %v2246_v19  ;;  %v2247_v30 = vunpack.i.l.bf16 %v2246_v19 }
 0x365   :  { %2144 = vmatpush3.bf16.xpose.msk.msra.mxu0 %vm2529_vm2, %v2139_v4  ;;  %2303 = vpow2.f32 %v382_v13 }
 0x366   :  { %v2300_v5 = vpop.eup %2299  ;;  %2305 = vpow2.f32 %v380_v14  ;;  %v2145_v38 = vpack.c.bf16 %v2248_v28, %v2247_v30 }
 0x367   :  { %v2302_v6 = vpop.eup %2301  ;;  %v387_v7 = vsel %vm359_vm3, %v2300_v5, 0.0 }
 0x368   :  { %388 = vadd.xlane.f32.xlu0 %v387_v7  ;;  %v384_v8 = vsel %vm359_vm3, %v2302_v6, 0.0 }
 0x369   :  { %385 = vadd.xlane.f32.xlu1 %v384_v8 }
 0x36f   :  { %v2304_v15 = vpop.eup %2303 }
 0x370   :  { %v2306_v16 = vpop.eup %2305  ;;  %v393_v17 = vsel %vm359_vm3, %v2304_v15, 0.0 }
 0x371   :  { %v390_v18 = vsel %vm359_vm3, %v2306_v16, 0.0 }
 0x37a   :  { %669 = vrot.lane.b32.xlu1 %v2517_v36, %s2418_s23 }
 0x37e   :  { %2235 = vrot.lane.b32.xlu0 %v2524_v37, %s2416_s4 }
 0x39d   :  { %394 = vadd.xlane.f32.xlu0 %v393_v17 }
 0x39e   :  { %391 = vadd.xlane.f32.xlu1 %v390_v18 }
 0x3af   :  { %671 = vrot.lane.b32.xlu1 %v2515_v34, %s2418_s23 }
 0x3b3   :  { %578 = vrot.lane.b32.xlu0 %v2507_v31, %s2418_s23 }
 0x3b7   :  { %580 = vrot.lane.b32.xlu0 %v2505_v29, %s2418_s23 }
 0x3f5   :  { %v389_v20 = vpop.xlane.xlu0 %388 }
 0x3f6   :  { %2307 = vrcp.f32 %v389_v20  ;;  %v386_v21 = vpop.xlane.xlu1 %385 }
 0x3f7   :  { %2309 = vrcp.f32 %v386_v21 }
 0x3f9   :  { %v2236_v22 = vpop.permute.xlu0 %2235 }
 0x3fa   :  { %v2238_v23 = vunpack.i.h.bf16 %v2236_v22  ;;  %v2237_v24 = vunpack.i.l.bf16 %v2236_v22  ;;  %v670_v39 = vpop.permute.xlu1 %669 }
 0x3fc   :  { %v2135_v25 = vpack.c.bf16 %v2238_v23, %v2237_v24 }
 0x3fe   :  { %2136 = vmatprep.subr.bf16.mxu1 %v2135_v25 }
 0x400   :  { %v2308_v26 = vpop.eup %2307 }
 0x401   :  { %v2310_v27 = vpop.eup %2309  ;;  %v401_v35 = vmul.f32 %v2308_v26, %v2300_v5 }
 0x402   :  { %v400_v32 = vmul.f32 %v2310_v27, %v2302_v6 }
 0x404   :  { %2017 = vmatprep.mubr.msk.f32.mxu1 %vm359_vm3, %v400_v32 }
 0x405   :  { %2018 = vmatmul.mubr.msk.f32.vlgmr.msra.gmra.mrb[2].mxu1 %vm359_vm3, %v401_v35 }
 0x406   :  { %2138 = vmatpush3.bf16.msra.mxu1 %v2135_v25 }
 0x407   :  { %2147 = vmatprep.subr.msk.bf16.mxu1 %vm2529_vm2, %v2145_v38 }
 0x42a   :  { %v395_v40 = vpop.xlane.xlu0 %394 }
 0x42b   :  { %2311 = vrcp.f32 %v395_v40  ;;  %v392_v42 = vpop.xlane.xlu1 %391 }
 0x42c   :  { %2313 = vrcp.f32 %v392_v42 }
 0x42e   :  { %v579_v43 = vpop.permute.xlu0 %578 }
 0x42f   :  { %2031 = vmatprep.mubr.msk.f32.mxu0 %vm186_vm1, %v579_v43  ;;  %v672_v49 = vpop.permute.xlu1 %671 }
 0x432   :  { %v581_v44 = vpop.permute.xlu0 %580 }
 0x433   :  { %2032 = vmatmul.mubr.msk.f32.vlgmr.msra.gmra.mrb[6].mxu0 %vm186_vm1, %v581_v44 }
 0x435   :  { %v2312_v45 = vpop.eup %2311 }
 0x436   :  { %v2314_v46 = vpop.eup %2313  ;;  %v403_v48 = vmul.f32 %v2312_v45, %v2304_v15 }
 0x437   :  { %v402_v47 = vmul.f32 %v2314_v46, %v2306_v16 }
 0x439   :  { %2024 = vmatprep.mubr.msk.f32.mxu1 %vm359_vm3, %v402_v47 }
 0x43a   :  { %2025 = vmatmul.mubr.msk.f32.vlgmr.msra.gmra.mrb[4].mxu1 %vm359_vm3, %v403_v48 }
 0x43b   :  { %2150 = vmatpush3.bf16.xpose.msk.msra.mxu1 %vm2529_vm2, %v2145_v38  ;;  %2038 = vmatprep.mubr.msk.f32.mxu1 %vm186_vm1, %v670_v39 }
 0x442   :  { %2039 = vmatmul.mubr.msk.f32.vlgmr.msra.gmra.mrb[6].mxu1 %vm186_vm1, %v672_v49 }
 0x4d8   :  { %v2579_v50 = vpop.f32.mrb[2].mxu1 }
 0x4d9   :  { %v2581_v51 = vpop.f32.mrb[3].mxu1 }
 0x506   :  { %v2033_v52 = vpop.f32.mrb[6].mxu0 }
 0x507   :  { %v660_v53 = vpop.f32.mrb[7].mxu0  ;;  %v763_v55 = vsel %vm359_vm3, %v2033_v52, -inf }
 0x508   :  { %v760_v54 = vsel %vm359_vm3, %v660_v53, -inf }
 0x509   :  { %761 = vmax.xlane.f32.xlu0 %v760_v54 }
 0x50d   :  { %764 = vmax.xlane.f32.xlu0 %v763_v55  ;;  %v2585_v56 = vpop.f32.mrb[4].mxu1 }
 0x50e   :  { %v2587_v57 = vpop.f32.mrb[5].mxu1 }
 0x515   :  { %v2040_v58 = vpop.f32.mrb[6].mxu1 }
 0x516   :  { %v751_v59 = vpop.f32.mrb[7].mxu1  ;;  %v769_v60 = vsel %vm359_vm3, %v2040_v58, -inf }
 0x517   :  { %770 = vmax.xlane.f32.xlu0 %v769_v60  ;;  %v766_v61 = vsel %vm359_vm3, %v751_v59, -inf }
 0x518   :  { %767 = vmax.xlane.f32.xlu1 %v766_v61 }
 0x52d   :  { %2255 = vrot.lane.b32.xlu0 %v2524_v37, %s2419_s24 }
 0x596   :  { %v762_v62 = vpop.xlane.xlu0 %761 }
 0x597   :  { %v772_v63 = vsub.f32 %v660_v53, %v762_v62 }
 0x599   :  { %v776_v0 = vmul.f32 1.442695, %v772_v63 }
 0x59a   :  { %v765_v1 = vpop.xlane.xlu0 %764 }
 0x59b   :  { %2315 = vpow2.f32 %v776_v0  ;;  %v773_v2 = vsub.f32 %v2033_v52, %v765_v1 }
 0x59d   :  { %v778_v3 = vmul.f32 1.442695, %v773_v2 }
 0x59f   :  { %2317 = vpow2.f32 %v778_v3 }
 0x5a4   :  { %v771_v4 = vpop.xlane.xlu0 %770 }
 0x5a5   :  { %v2316_v5 = vpop.eup %2315  ;;  %v775_v6 = vsub.f32 %v2040_v58, %v771_v4  ;;  %v768_v7 = vpop.xlane.xlu1 %767 }
 0x5a6   :  { %v774_v8 = vsub.f32 %v751_v59, %v768_v7  ;;  %v784_v9 = vsel %vm359_vm3, %v2316_v5, 0.0 }
 0x5a7   :  { %v782_v10 = vmul.f32 1.442695, %v775_v6  ;;  %785 = vadd.xlane.f32.xlu1 %v784_v9 }
 0x5a8   :  { %v780_v11 = vmul.f32 1.442695, %v774_v8  ;;  %v2256_v12 = vpop.permute.xlu0 %2255 }
 0x5a9   :  { %v2318_v13 = vpop.eup %2317  ;;  %2319 = vpow2.f32 %v782_v10  ;;  %v2258_v14 = vunpack.i.h.bf16 %v2256_v12  ;;  %v2257_v15 = vunpack.i.l.bf16 %v2256_v12 }
 0x5aa   :  { %v787_v16 = vsel %vm359_vm3, %v2318_v13, 0.0  ;;  %2321 = vpow2.f32 %v780_v11 }
 0x5ab   :  { %v2155_v17 = vpack.c.bf16 %v2258_v14, %v2257_v15  ;;  %788 = vadd.xlane.f32.xlu1 %v787_v16 }
 0x5ad   :  { %2156 = vmatprep.subr.bf16.mxu1 %v2155_v17 }
 0x5ae   :  { %2158 = vmatpush3.bf16.msra.mxu1 %v2155_v17 }
 0x5b3   :  { %v2320_v18 = vpop.eup %2319 }
 0x5b4   :  { %v793_v19 = vsel %vm359_vm3, %v2320_v18, 0.0  ;;  %v2322_v20 = vpop.eup %2321 }
 0x5b5   :  { %794 = vadd.xlane.f32.xlu0 %v793_v19  ;;  %v790_v21 = vsel %vm359_vm3, %v2322_v20, 0.0 }
 0x5b9   :  { %791 = vadd.xlane.f32.xlu0 %v790_v21 }
 0x5bc   :  { %2250 = vrot.lane.b32.xlu1 %v2513_v33, %s2419_s24 }
 0x5c0   :  { %2260 = vrot.lane.b32.xlu1 %v2513_v33, %s2420_s25 }
 0x5c4   :  { %2265 = vrot.lane.b32.xlu1 %v2524_v37, %s2420_s25 }
 0x5c8   :  { %1069 = vrot.lane.b32.xlu1 %v2517_v36, %s2421_s26 }
 0x5cc   :  { %1071 = vrot.lane.b32.xlu1 %v2515_v34, %s2421_s26 }
 0x5cf   :  { %978 = vrot.lane.b32.xlu0 %v2507_v31, %s2421_s26 }
 0x5d3   :  { %980 = vrot.lane.b32.xlu0 %v2505_v29, %s2421_s26 }
 0x634   :  { %v786_v22 = vpop.xlane.xlu1 %785 }
 0x635   :  { %2323 = vrcp.f32 %v786_v22 }
 0x638   :  { %v789_v23 = vpop.xlane.xlu1 %788 }
 0x639   :  { %2325 = vrcp.f32 %v789_v23 }
 0x63c   :  { %v2251_v24 = vpop.permute.xlu1 %2250 }
 0x63d   :  { %v2253_v25 = vunpack.i.h.bf16 %v2251_v24  ;;  %v2252_v26 = vunpack.i.l.bf16 %v2251_v24 }
 0x63f   :  { %v2324_v27 = vpop.eup %2323  ;;  %v2151_v28 = vpack.c.bf16 %v2253_v25, %v2252_v26 }
 0x640   :  { %v2261_v30 = vpop.permute.xlu1 %2260  ;;  %v800_v32 = vmul.f32 %v2324_v27, %v2316_v5 }
 0x641   :  { %v2263_v35 = vunpack.i.h.bf16 %v2261_v30  ;;  %v2262_v38 = vunpack.i.l.bf16 %v2261_v30  ;;  %2152 = vmatprep.subr.bf16.mxu0 %v2151_v28 }
 0x642   :  { %v795_v39 = vpop.xlane.xlu0 %794  ;;  %2154 = vmatpush3.bf16.msra.mxu0 %v2151_v28  ;;  %2045 = vmatprep.mubr.msk.f32.mxu0 %vm359_vm3, %v800_v32 }
 0x643   :  { %v2326_v40 = vpop.eup %2325  ;;  %v2159_v42 = vpack.c.bf16 %v2263_v35, %v2262_v38  ;;  %2327 = vrcp.f32 %v795_v39 }
 0x644   :  { %v801_v43 = vmul.f32 %v2326_v40, %v2318_v13  ;;  %v2266_v44 = vpop.permute.xlu1 %2265 }
 0x645   :  { %v2268_v45 = vunpack.i.h.bf16 %v2266_v44  ;;  %v2267_v46 = vunpack.i.l.bf16 %v2266_v44  ;;  %2161 = vmatprep.subr.msk.bf16.mxu0 %vm2529_vm2, %v2159_v42 }
 0x646   :  { %v792_v47 = vpop.xlane.xlu0 %791  ;;  %2046 = vmatmul.mubr.msk.f32.vlgmr.msra.gmra.mrb[8].mxu0 %vm359_vm3, %v801_v43 }
 0x647   :  { %v2165_v48 = vpack.c.bf16 %v2268_v45, %v2267_v46  ;;  %2329 = vrcp.f32 %v792_v47 }
 0x648   :  { %v1070_v59 = vpop.permute.xlu1 %1069 }
 0x649   :  { %2167 = vmatprep.subr.msk.bf16.mxu1 %vm2529_vm2, %v2165_v48 }
 0x64a   :  { %v979_v49 = vpop.permute.xlu0 %978 }
 0x64b   :  { %2059 = vmatprep.mubr.msk.f32.mxu0 %vm186_vm1, %v979_v49  ;;  %2164 = vmatpush3.bf16.xpose.msk.msra.mxu0 %vm2529_vm2, %v2159_v42 }
 0x64c   :  { %v1072_v60 = vpop.permute.xlu1 %1071 }
 0x64d   :  { %v2328_v52 = vpop.eup %2327 }
 0x64e   :  { %v981_v54 = vpop.permute.xlu0 %980  ;;  %v803_v58 = vmul.f32 %v2328_v52, %v2320_v18 }
 0x651   :  { %v2330_v53 = vpop.eup %2329 }
 0x652   :  { %2060 = vmatmul.mubr.msk.f32.vlgmr.msra.gmra.mrb[10].mxu0 %vm186_vm1, %v981_v54  ;;  %v802_v55 = vmul.f32 %v2330_v53, %v2322_v20 }
 0x654   :  { %2052 = vmatprep.mubr.msk.f32.mxu1 %vm359_vm3, %v802_v55 }
 0x655   :  { %2053 = vmatmul.mubr.msk.f32.vlgmr.msra.gmra.mrb[8].mxu1 %vm359_vm3, %v803_v58 }
 0x656   :  { %2170 = vmatpush3.bf16.xpose.msk.msra.mxu1 %vm2529_vm2, %v2165_v48  ;;  %2066 = vmatprep.mubr.msk.f32.mxu1 %vm186_vm1, %v1070_v59 }
 0x65d   :  { %2067 = vmatmul.mubr.msk.f32.vlgmr.msra.gmra.mrb[10].mxu1 %vm186_vm1, %v1072_v60 }
 0x719   :  { %v2621_v61 = vpop.f32.mrb[8].mxu0 }
 0x71a   :  { %v2623_v62 = vpop.f32.mrb[9].mxu0 }
 0x725   :  { %v2061_v63 = vpop.f32.mrb[10].mxu0 }
 0x726   :  { %v1060_v0 = vpop.f32.mrb[11].mxu0  ;;  %v1163_v4 = vsel %vm359_vm3, %v2061_v63, -inf }
 0x727   :  { %v1160_v1 = vsel %vm359_vm3, %v1060_v0, -inf }
 0x728   :  { %v2626_v2 = vpop.f32.mrb[8].mxu1  ;;  %1161 = vmax.xlane.f32.xlu0 %v1160_v1 }
 0x729   :  { %v2628_v3 = vpop.f32.mrb[9].mxu1 }
 0x72c   :  { %1164 = vmax.xlane.f32.xlu0 %v1163_v4 }
 0x730   :  { %v2068_v5 = vpop.f32.mrb[10].mxu1 }
 0x731   :  { %v1151_v6 = vpop.f32.mrb[11].mxu1  ;;  %v1169_v7 = vsel %vm359_vm3, %v2068_v5, -inf }
 0x732   :  { %1170 = vmax.xlane.f32.xlu0 %v1169_v7  ;;  %v1166_v8 = vsel %vm359_vm3, %v1151_v6, -inf }
 0x733   :  { %1167 = vmax.xlane.f32.xlu1 %v1166_v8 }
 0x748   :  { %2275 = vrot.lane.b32.xlu0 %v2524_v37, %s2422_s27 }
 0x7b5   :  { %v1162_v9 = vpop.xlane.xlu0 %1161 }
 0x7b6   :  { %v1172_v10 = vsub.f32 %v1060_v0, %v1162_v9 }
 0x7b8   :  { %v1176_v11 = vmul.f32 1.442695, %v1172_v10 }
 0x7b9   :  { %v1165_v12 = vpop.xlane.xlu0 %1164 }
 0x7ba   :  { %2331 = vpow2.f32 %v1176_v11  ;;  %v1173_v13 = vsub.f32 %v2061_v63, %v1165_v12 }
 0x7bc   :  { %v1178_v14 = vmul.f32 1.442695, %v1173_v13 }
 0x7be   :  { %2333 = vpow2.f32 %v1178_v14 }
 0x7bf   :  { %v1171_v15 = vpop.xlane.xlu0 %1170 }
 0x7c0   :  { %v1175_v16 = vsub.f32 %v2068_v5, %v1171_v15  ;;  %v1168_v17 = vpop.xlane.xlu1 %1167 }
 0x7c1   :  { %v1174_v18 = vsub.f32 %v1151_v6, %v1168_v17 }
 0x7c2   :  { %v1182_v19 = vmul.f32 1.442695, %v1175_v16 }
 0x7c3   :  { %v1180_v20 = vmul.f32 1.442695, %v1174_v18  ;;  %v2276_v21 = vpop.permute.xlu0 %2275 }
 0x7c4   :  { %v2332_v22 = vpop.eup %2331  ;;  %2335 = vpow2.f32 %v1182_v19  ;;  %v2278_v23 = vunpack.i.h.bf16 %v2276_v21  ;;  %v2277_v24 = vunpack.i.l.bf16 %v2276_v21 }
 0x7c5   :  { %v1184_v25 = vsel %vm359_vm3, %v2332_v22, 0.0  ;;  %2337 = vpow2.f32 %v1180_v20 }
 0x7c6   :  { %v2175_v26 = vpack.c.bf16 %v2278_v23, %v2277_v24  ;;  %1185 = vadd.xlane.f32.xlu1 %v1184_v25 }
 0x7c8   :  { %v2334_v27 = vpop.eup %2333  ;;  %2176 = vmatprep.subr.bf16.mxu1 %v2175_v26 }
 0x7c9   :  { %2178 = vmatpush3.bf16.msra.mxu1 %v2175_v26  ;;  %v1187_v28 = vsel %vm359_vm3, %v2334_v27, 0.0 }
 0x7ca   :  { %1188 = vadd.xlane.f32.xlu1 %v1187_v28 }
 0x7ce   :  { %v2336_v30 = vpop.eup %2335 }
 0x7cf   :  { %v1193_v32 = vsel %vm359_vm3, %v2336_v30, 0.0  ;;  %v2338_v35 = vpop.eup %2337 }
 0x7d0   :  { %1194 = vadd.xlane.f32.xlu0 %v1193_v32  ;;  %v1190_v38 = vsel %vm359_vm3, %v2338_v35, 0.0 }
 0x7d4   :  { %1191 = vadd.xlane.f32.xlu0 %v1190_v38 }
 0x7db   :  { %2270 = vrot.lane.b32.xlu1 %v2513_v33, %s2422_s27 }
 0x7df   :  { %2280 = vrot.lane.b32.xlu1 %v2513_v33, %s2423_s30 }
 0x7e3   :  { %2285 = vrot.lane.b32.xlu1 %v2524_v37, %s2423_s30 }
 0x7e7   :  { %1469 = vrot.lane.b32.xlu1 %v2517_v36, %s2424_s6 }
 0x7ea   :  { %1378 = vrot.lane.b32.xlu0 %v2507_v31, %s2424_s6 }
 0x7eb   :  { %1471 = vrot.lane.b32.xlu1 %v2515_v34, %s2424_s6 }
 0x7ee   :  { %1380 = vrot.lane.b32.xlu0 %v2505_v29, %s2424_s6 }
 0x853   :  { %v1186_v39 = vpop.xlane.xlu1 %1185 }
 0x854   :  { %2339 = vrcp.f32 %v1186_v39 }
 0x857   :  { %v1189_v40 = vpop.xlane.xlu1 %1188 }
 0x858   :  { %2341 = vrcp.f32 %v1189_v40 }
 0x85b   :  { %v2271_v42 = vpop.permute.xlu1 %2270 }
 0x85c   :  { %v2273_v43 = vunpack.i.h.bf16 %v2271_v42  ;;  %v2272_v44 = vunpack.i.l.bf16 %v2271_v42 }
 0x85d   :  { %v1195_v45 = vpop.xlane.xlu0 %1194 }
 0x85e   :  { %v2340_v46 = vpop.eup %2339  ;;  %v2171_v47 = vpack.c.bf16 %v2273_v43, %v2272_v44  ;;  %2343 = vrcp.f32 %v1195_v45 }
 0x85f   :  { %v2281_v48 = vpop.permute.xlu1 %2280  ;;  %v1200_v49 = vmul.f32 %v2340_v46, %v2332_v22 }
 0x860   :  { %v2283_v52 = vunpack.i.h.bf16 %v2281_v48  ;;  %v2282_v36 = vunpack.i.l.bf16 %v2281_v48  ;;  %2172 = vmatprep.subr.bf16.mxu0 %v2171_v47 }
 0x861   :  { %v1192_v31 = vpop.xlane.xlu0 %1191  ;;  %2174 = vmatpush3.bf16.msra.mxu0 %v2171_v47  ;;  %2073 = vmatprep.mubr.msk.f32.mxu0 %vm359_vm3, %v1200_v49 }
 0x862   :  { %v2342_v29 = vpop.eup %2341  ;;  %v2179_v34 = vpack.c.bf16 %v2283_v52, %v2282_v36  ;;  %2345 = vrcp.f32 %v1192_v31 }
 0x863   :  { %v1201_v53 = vmul.f32 %v2342_v29, %v2334_v27  ;;  %v2286_v54 = vpop.permute.xlu1 %2285 }
 0x864   :  { %v2288_v55 = vunpack.i.h.bf16 %v2286_v54  ;;  %v2287_v58 = vunpack.i.l.bf16 %v2286_v54  ;;  %2181 = vmatprep.subr.msk.bf16.mxu0 %vm2529_vm2, %v2179_v34 }
 0x865   :  { %v1379_v59 = vpop.permute.xlu0 %1378  ;;  %2074 = vmatmul.mubr.msk.f32.vlgmr.msra.gmra.mrb[12].mxu0 %vm359_vm3, %v1201_v53 }
 0x866   :  { %v2185_v60 = vpack.c.bf16 %v2288_v55, %v2287_v58  ;;  %2087 = vmatprep.mubr.msk.f32.mxu0 %vm186_vm1, %v1379_v59 }
 0x867   :  { %v1470_v5 = vpop.permute.xlu1 %1469 }
 0x868   :  { %2187 = vmatprep.subr.msk.bf16.mxu1 %vm2529_vm2, %v2185_v60  ;;  %v2344_v63 = vpop.eup %2343 }
 0x869   :  { %v1203_v4 = vmul.f32 %v2344_v63, %v2336_v30  ;;  %v1381_v6 = vpop.permute.xlu0 %1380 }
 0x86a   :  { %2184 = vmatpush3.bf16.xpose.msk.msra.mxu0 %vm2529_vm2, %v2179_v34 }
 0x86b   :  { %v1472_v7 = vpop.permute.xlu1 %1471 }
 0x86c   :  { %v2346_v0 = vpop.eup %2345 }
 0x86d   :  { %v1202_v1 = vmul.f32 %v2346_v0, %v2338_v35 }
 0x86f   :  { %2080 = vmatprep.mubr.msk.f32.mxu1 %vm359_vm3, %v1202_v1 }
 0x870   :  { %2081 = vmatmul.mubr.msk.f32.vlgmr.msra.gmra.mrb[12].mxu1 %vm359_vm3, %v1203_v4 }
 0x871   :  { %2190 = vmatpush3.bf16.xpose.msk.msra.mxu1 %vm2529_vm2, %v2185_v60  ;;  %2094 = vmatprep.mubr.msk.f32.mxu1 %vm186_vm1, %v1470_v5 }
 0x872   :  { %2088 = vmatmul.mubr.msk.f32.vlgmr.msra.gmra.mrb[14].mxu0 %vm186_vm1, %v1381_v6 }
 0x878   :  { %2095 = vmatmul.mubr.msk.f32.vlgmr.msra.gmra.mrb[14].mxu1 %vm186_vm1, %v1472_v7 }
 0x938   :  { %v2075_v8 = vpop.f32.mrb[12].mxu0 }
 0x939   :  { %v1282_v9 = vpop.f32.mrb[13].mxu0 }
 0x943   :  { %v2082_v10 = vpop.f32.mrb[12].mxu1 }
 0x944   :  { %v1369_v11 = vpop.f32.mrb[13].mxu1 }
 0x945   :  { %v2089_v12 = vpop.f32.mrb[14].mxu0 }
 0x946   :  { %v1460_v13 = vpop.f32.mrb[15].mxu0  ;;  %v1563_v41 = vsel %vm359_vm3, %v2089_v12, -inf }
 0x947   :  { %v1560_v14 = vsel %vm359_vm3, %v1460_v13, -inf }
 0x948   :  { %1561 = vmax.xlane.f32.xlu0 %v1560_v14 }
 0x94b   :  { %v2096_v15 = vpop.f32.mrb[14].mxu1 }
 0x94c   :  { %v1551_v16 = vpop.f32.mrb[15].mxu1  ;;  %1564 = vmax.xlane.f32.xlu0 %v1563_v41  ;;  %v1569_v18 = vsel %vm359_vm3, %v2096_v15, -inf }
 0x94d   :  { %v1566_v17 = vsel %vm359_vm3, %v1551_v16, -inf }
 0x94e   :  { %1567 = vmax.xlane.f32.xlu1 %v1566_v17 }
 0x950   :  { %1570 = vmax.xlane.f32.xlu0 %v1569_v18 }
 0x9d5   :  { %v1562_v19 = vpop.xlane.xlu0 %1561 }
 0x9d6   :  { %v1572_v20 = vsub.f32 %v1460_v13, %v1562_v19 }
 0x9d8   :  { %v1576_v21 = vmul.f32 1.442695, %v1572_v20 }
 0x9d9   :  { %v1565_v22 = vpop.xlane.xlu0 %1564 }
 0x9da   :  { %2347 = vpow2.f32 %v1576_v21  ;;  %v1573_v23 = vsub.f32 %v2089_v12, %v1565_v22 }
 0x9db   :  { %v1568_v24 = vpop.xlane.xlu1 %1567 }
 0x9dc   :  { %v1578_v25 = vmul.f32 1.442695, %v1573_v23  ;;  %v1574_v26 = vsub.f32 %v1551_v16, %v1568_v24 }
 0x9dd   :  { %v1571_v27 = vpop.xlane.xlu0 %1570 }
 0x9de   :  { %2349 = vpow2.f32 %v1578_v25  ;;  %v1575_v28 = vsub.f32 %v2096_v15, %v1571_v27  ;;  %v1580_v30 = vmul.f32 1.442695, %v1574_v26 }
 0x9e0   :  { %v1582_v32 = vmul.f32 1.442695, %v1575_v28 }
 0x9e2   :  { %2351 = vpow2.f32 %v1582_v32 }
 0x9e3   :  { %2353 = vpow2.f32 %v1580_v30 }
 0x9e4   :  { %v2348_v35 = vpop.eup %2347 }
 0x9e5   :  { %v1584_v38 = vsel %vm359_vm3, %v2348_v35, 0.0 }
 0x9e6   :  { %1585 = vadd.xlane.f32.xlu1 %v1584_v38 }
 0x9e8   :  { %v2350_v39 = vpop.eup %2349 }
 0x9e9   :  { %v1587_v40 = vsel %vm359_vm3, %v2350_v39, 0.0 }
 0x9ea   :  { %1588 = vadd.xlane.f32.xlu1 %v1587_v40 }
 0x9ec   :  { %v2352_v42 = vpop.eup %2351 }
 0x9ed   :  { %v1593_v43 = vsel %vm359_vm3, %v2352_v42, 0.0  ;;  %v2354_v44 = vpop.eup %2353 }
 0x9ee   :  { %1594 = vadd.xlane.f32.xlu0 %v1593_v43  ;;  %v1590_v45 = vsel %vm359_vm3, %v2354_v44, 0.0 }
 0x9f2   :  { %1591 = vadd.xlane.f32.xlu0 %v1590_v45 }
 0x9fb   :  { %2290 = vrot.lane.b32.xlu1 %v2513_v33, %s2425_s7 }
 0x9ff   :  { %1782 = vrot.lane.b32.xlu1 %v2623_v62, %s2413_s29 }
 0xa03   :  { %1784 = vrot.lane.b32.xlu1 %v2621_v61, %s2413_s29 }
 0xa07   :  { %1788 = vrot.lane.b32.xlu1 %v2626_v2, %s2413_s29 }
 0xa08   :  { %2295 = vrot.lane.b32.xlu0 %v2524_v37, %s2425_s7 }
 0xa0b   :  { %1800 = vrot.lane.b32.xlu1 %v2075_v8, %s2426_s8 }
 0xa0c   :  { %1786 = vrot.lane.b32.xlu0 %v2628_v3, %s2413_s29 }
 0xa0f   :  { %1804 = vrot.lane.b32.xlu1 %v2082_v10, %s2426_s8 }
 0xa10   :  { %1798 = vrot.lane.b32.xlu0 %v1282_v9, %s2426_s8 }
 0xa14   :  { %1802 = vrot.lane.b32.xlu0 %v1369_v11, %s2426_s8 }
 0xa73   :  { %v1586_v33 = vpop.xlane.xlu1 %1585 }
 0xa74   :  { %2355 = vrcp.f32 %v1586_v33 }
 0xa77   :  { %v1589_v46 = vpop.xlane.xlu1 %1588 }
 0xa78   :  { %2357 = vrcp.f32 %v1589_v46 }
 0xa7b   :  { %v1595_v62 = vpop.xlane.xlu0 %1594  ;;  %v2291_v47 = vpop.permute.xlu1 %2290 }
 0xa7c   :  { %v2293_v61 = vunpack.i.h.bf16 %v2291_v47  ;;  %v2292_v48 = vunpack.i.l.bf16 %v2291_v47  ;;  %2359 = vrcp.f32 %v1595_v62 }
 0xa7e   :  { %v2356_v49 = vpop.eup %2355  ;;  %v2191_v2 = vpack.c.bf16 %v2293_v61, %v2292_v48 }
 0xa7f   :  { %v1592_v37 = vpop.xlane.xlu0 %1591  ;;  %v1600_v52 = vmul.f32 %v2356_v49, %v2348_v35  ;;  %v1783_v4 = vpop.permute.xlu1 %1782 }
 0xa80   :  { %2361 = vrcp.f32 %v1592_v37  ;;  %2192 = vmatprep.subr.bf16.mxu0 %v2191_v2  ;;  %v1826_v13 = vsel %vm186_vm1, %v2581_v51, %v1783_v4 }
 0xa81   :  { %2194 = vmatpush3.bf16.msra.mxu0 %v2191_v2  ;;  %2101 = vmatprep.mubr.msk.f32.mxu0 %vm359_vm3, %v1600_v52 }
 0xa82   :  { %v2358_v3 = vpop.eup %2357 }
 0xa83   :  { %v1601_v36 = vmul.f32 %v2358_v3, %v2350_v39  ;;  %v2296_v31 = vpop.permute.xlu0 %2295  ;;  %v1785_v5 = vpop.permute.xlu1 %1784 }
 0xa84   :  { %v2298_v29 = vunpack.i.h.bf16 %v2296_v31  ;;  %v2297_v34 = vunpack.i.l.bf16 %v2296_v31  ;;  %v1827_v12 = vsel %vm186_vm1, %v2579_v50, %v1785_v5 }
 0xa85   :  { %2102 = vmatmul.mubr.msk.f32.vlgmr.msra.gmra.mrb[16].mxu0 %vm359_vm3, %v1601_v36 }
 0xa86   :  { %v2195_v53 = vpack.c.bf16 %v2298_v29, %v2297_v34  ;;  %v2360_v54 = vpop.eup %2359 }
 0xa87   :  { %v1603_v59 = vmul.f32 %v2360_v54, %v2352_v42  ;;  %v1789_v6 = vpop.permute.xlu1 %1788  ;;  %v1787_v7 = vpop.permute.xlu0 %1786 }
 0xa88   :  { %2196 = vmatprep.subr.bf16.mxu1 %v2195_v53  ;;  %v1829_v50 = vsel %vm186_vm1, %v2585_v56, %v1789_v6  ;;  %v1828_v51 = vsel %vm186_vm1, %v2587_v57, %v1787_v7 }
 0xa89   :  { %2198 = vmatpush3.bf16.msra.mxu1 %v2195_v53 }
 0xa8a   :  { %v2362_v55 = vpop.eup %2361 }
 0xa8b   :  { %v1602_v58 = vmul.f32 %v2362_v55, %v2354_v44  ;;  %v1801_v8 = vpop.permute.xlu1 %1800  ;;  %v1799_v9 = vpop.permute.xlu0 %1798 }
 0xa8c   :  { %v1831_v14 = vsel %vm359_vm3, %v1827_v12, %v1801_v8  ;;  %v1830_v41 = vsel %vm359_vm3, %v1826_v13, %v1799_v9 }
 0xa8d   :  { %2108 = vmatprep.mubr.msk.f32.mxu1 %vm359_vm3, %v1602_v58 }
 0xa8e   :  { %2109 = vmatmul.mubr.msk.f32.vlgmr.msra.gmra.mrb[16].mxu1 %vm359_vm3, %v1603_v59 }
 0xa8f   :  { %v1805_v10 = vpop.permute.xlu1 %1804  ;;  %v1803_v11 = vpop.permute.xlu0 %1802 }
 0xa90   :  { %v1833_v19 = vsel %vm359_vm3, %v1829_v50, %v1805_v10  ;;  %v1832_v21 = vsel %vm359_vm3, %v1828_v51, %v1803_v11 }
 0xb58   :  { %v2103_v60 = vpop.f32.mrb[16].mxu0 }
 0xb59   :  { %1816 = vrot.lane.b32.xlu1 %v2103_v60, %s2427_s9  ;;  %v1682_v63 = vpop.f32.mrb[17].mxu0 }
 0xb5a   :  { %1814 = vrot.lane.b32.xlu0 %v1682_v63, %s2427_s9 }
 0xb61   :  { %v2110_v0 = vpop.f32.mrb[16].mxu1 }
 0xb62   :  { %v1769_v1 = vpop.f32.mrb[17].mxu1  ;;  %1820 = vrot.lane.b32.xlu1 %v2110_v0, %s2427_s9 }
 0xb63   :  { %1818 = vrot.lane.b32.xlu0 %v1769_v1, %s2427_s9 }
 0xbcb   :  { %v1817_v15 = vpop.permute.xlu1 %1816 }
 0xbcc   :  { %v1836_v16 = vsel %vm1834_vm4, %v1831_v14, %v1817_v15  ;;  %v1815_v17 = vpop.permute.xlu0 %1814 }
 0xbcd   :  { %1840 = vst.msk [vmem:[#allocation5 + $0x8] sm:$0xff] %vm82_vm0, %v1836_v16  ;;  %v1835_v18 = vsel %vm1834_vm4, %v1830_v41, %v1815_v17 }
 0xbce   :  { %1839 = vst.msk [vmem:[#allocation5] sm:$0xff] %vm82_vm0, %v1835_v18 }
 0xbd4   :  { %v1821_v20 = vpop.permute.xlu1 %1820 }
 0xbd5   :  { %v1838_v22 = vsel %vm1834_vm4, %v1833_v19, %v1821_v20  ;;  %v1819_v23 = vpop.permute.xlu0 %1818 }
 0xbd6   :  { %1842 = vst.msk [vmem:[#allocation5 + $0x18] sm:$0xff] %vm82_vm0, %v1838_v22  ;;  %v1837_v24 = vsel %vm1834_vm4, %v1832_v21, %v1819_v23 }
 0xbd7   :  { %1841 = vst.msk [vmem:[#allocation5 + $0x10] sm:$0xff] %vm82_vm0, %v1837_v24 }
 0xbd8   :  { %2396 = shalt.err (!%p2393_p12)
}
 0xbd9   :  { %s2397_s14 = scalar_lea.hbm %s2725_s5, 512 }
 0xbda   :  { %p2398_p13 = scmp.ne.s32.totalorder %s2725_s5, %s2397_s14  ;;  %p2401_p0 = scmp.lt.u32.totalorder %s2397_s14, %s2725_s5 }
 0xbdc   :  { %p2403_p1 = pnand %p2401_p0, %p2398_p13 }
 0xbde   :  { %2406 = shalt.err (!%p2403_p1)
}
 0xbdf   :  { %1854 = dma.vmem_to_hbm [thread:$0]  %s1849_s11, 512, %s2725_s5, [#allocation4], %s2412_s28, %s2412_s28, %s2413_s29  }
 0xbe0   :  { %2409 = dma.done.wait [#allocation4], 512  }
 0xbe1   :  { %2410 = vsyncadd [#allocation4], 4294966784 }
 0xbe2   :  { %1858 = vsyncpa [#allocation3], 1 }
 0xbe3   :  { %1859 = vsyncpa [#allocation4], 1 }

</bundles_post_ra>
